<compile_context>
chip_gen: v7x
topology: tpu7x:2x2x1
jax: 0.10.0
libtpu: 0.0.40
codegen_flags: <defaults>
</compile_context>

<pallas_src>
import functools
import math

import jax
import jax.numpy as jnp
from jax.experimental import pallas as pl
from jax.experimental.pallas import tpu as pltpu


_UNROLL = 4  # partial unroll of the per-row gather / DMA-issue loops


def _ceil_div(a, b):
    return -(-a // b)


# ----------------------------- Pallas kernels ------------------------------ #

def _alpt_vmem_table_kernel(idx_ref, w_ref, o_ref, *, tile_n, order,
                            alpha, low, high):
    """Fast path: table resident in VMEM; gather via dynamic sub-lane indexing.

    idx_ref: (N_chunk,) int32 indices, scalar-prefetched into SMEM
    w_ref:   (F, D) embedding table, resident VMEM block (same block each step)
    o_ref:   (tile_n, D) output tile in VMEM
    """
    base = pl.program_id(0) * tile_n

    @pl.loop(0, tile_n // _UNROLL)
    def _gather(g):
        r0 = g * _UNROLL
        for u in range(_UNROLL):               # static partial unroll
            r = r0 + u
            row = idx_ref[base + r]
            o_ref[pl.ds(r, 1), :] = w_ref[pl.ds(row, 1), :]

    if order == 2:
        # LSQ forward: round(w / alpha).clamp(low, high) * alpha
        q = jnp.clip(jnp.round(o_ref[...] / alpha), low, high) * alpha
        o_ref[...] = q.astype(o_ref.dtype)


def _alpt_hbm_gather_kernel(idx_ref, w_hbm, o_ref, sem, *, tile_n, order,
                            alpha, low, high):
    """Large-table path: per-row DMAs HBM -> output tile, one aggregated wait.

    idx_ref: (N_chunk,) int32 indices in SMEM
    w_hbm:   (F, D) embedding table, left in HBM (pl.ANY)
    o_ref:   (tile_n, D) output tile in VMEM (DMA destination)
    sem:     (1,) DMA semaphore shared by all row copies of this step
    """
    base = pl.program_id(0) * tile_n

    @pl.loop(0, tile_n // _UNROLL)
    def _issue(g):
        r0 = g * _UNROLL
        for u in range(_UNROLL):               # static partial unroll
            r = r0 + u
            row = idx_ref[base + r]
            pltpu.make_async_copy(
                w_hbm.at[pl.ds(row, 1), :],
                o_ref.at[pl.ds(r, 1), :],
                sem.at[0],
            ).start()

    # Single aggregated wait: DMA semaphores count bytes, so one descriptor
    # sized like the full (tile_n, D) tile releases every row copy above.
    pltpu.make_async_copy(o_ref, o_ref, sem.at[0]).wait()

    if order == 2:
        q = jnp.clip(jnp.round(o_ref[...] / alpha), low, high) * alpha
        o_ref[...] = q.astype(o_ref.dtype)


# ------------------------------- wrapper ------------------------------------ #

def alpt_embedding_forward(x, weight, *, order=1, alpha=1.0, bit=8,
                           tile_n=1024, table_vmem_budget=16 << 20,
                           force_hbm=False):
    """Pallas forward of ALPT_Embedding.

    x:      (B, S) integer indices
    weight: (F, D) float embedding table
    returns (B, S, D) in weight.dtype
    """
    if order not in (1, 2):
        raise ValueError(f"unsupported order={order}")

    b, s = x.shape
    feat, dim = weight.shape
    n = b * s
    itemsize = jnp.dtype(weight.dtype).itemsize
    table_bytes = feat * dim * itemsize

    use_vmem_table = (not force_hbm) and (table_bytes <= table_vmem_budget)

    # ---- tile sizing: multiples of 8 rows, bounded by an 8 MiB output buffer.
    n8 = 8 * _ceil_div(n, 8)
    tn = max(8, min(int(tile_n), n8, max(8, (8 << 20) // (dim * itemsize))))
    tn = 8 * _ceil_div(tn, 8)
    n_pad = tn * _ceil_div(n, tn)

    # ---- indices: clamp OOB (torch would raise; we clamp), pad the tail with 0.
    idx_flat = jnp.clip(x.reshape(n).astype(jnp.int32), 0, feat - 1)
    idx_pad = jnp.pad(idx_flat, (0, n_pad - n))

    alpha_f = float(alpha)
    low = float(-(2 ** (bit - 1)))
    high = float(2 ** (bit - 1) - 1)
    common = dict(tile_n=tn, order=int(order), alpha=alpha_f, low=low, high=high)

    out_buf_bytes = 2 * tn * dim * itemsize          # double-buffered output
    if use_vmem_table:
        needed = 2 * table_bytes + out_buf_bytes     # table may be double-buffered
    else:
        needed = out_buf_bytes
    vmem_limit = int(min(max(needed + (4 << 20), 32 << 20), 128 << 20))

    def run_chunk(idx_chunk, n_rows):
        if use_vmem_table:
            kernel = functools.partial(_alpt_vmem_table_kernel, **common)
            in_specs = [pl.BlockSpec((feat, dim), lambda i, idx: (0, 0))]
            scratch = []
        else:
            kernel = functools.partial(_alpt_hbm_gather_kernel, **common)
            in_specs = [pl.BlockSpec(memory_space=pl.ANY)]   # table stays in HBM
            scratch = [pltpu.SemaphoreType.DMA((1,))]
        return pl.pallas_call(
            kernel,
            out_shape=jax.ShapeDtypeStruct((n_rows, dim), weight.dtype),
            grid_spec=pltpu.PrefetchScalarGridSpec(
                num_scalar_prefetch=1,                       # indices -> SMEM
                grid=(n_rows // tn,),
                in_specs=in_specs,
                out_specs=pl.BlockSpec((tn, dim), lambda i, idx: (i, 0)),
                scratch_shapes=scratch,
            ),
            compiler_params=pltpu.CompilerParams(
                dimension_semantics=("parallel",),
                vmem_limit_bytes=vmem_limit),
        )(idx_chunk, weight)

    # Chunk over N so the scalar-prefetched index array stays small in SMEM.
    rows_per_chunk = tn * max(1, (1 << 20) // tn)
    if n_pad <= rows_per_chunk:
        out_pad = run_chunk(idx_pad, n_pad)
    else:
        pieces = []
        for start in range(0, n_pad, rows_per_chunk):
            stop = min(start + rows_per_chunk, n_pad)
            pieces.append(run_chunk(idx_pad[start:stop], stop - start))
        out_pad = jnp.concatenate(pieces, axis=0)

    return out_pad[:n].reshape(b, s, dim)


# ------------------------- parameter construction -------------------------- #

def init_alpt_embedding_params(key, feature_num, emb_dim, bit,
                               emb_init="normal_0.003"):
    """Deterministic re-implementation of ALPT_Embedding.__init__ (+ post_quantizer)."""
    k_w, k_rand = jax.random.split(key)

    # Embedding.__init__: weight init
    if "normal" in emb_init:
        std = float(emb_init.split("_")[1])
        weight = std * jax.random.normal(k_w, (feature_num, emb_dim), jnp.float32)
    elif "uniform" in emb_init:
        v = float(emb_init.split("_")[1])
        weight = jax.random.uniform(k_w, (feature_num, emb_dim), jnp.float32,
                                    minval=-v, maxval=v)
    else:  # xavier
        bound = math.sqrt(6.0 / (feature_num + emb_dim))
        weight = jax.random.uniform(k_w, (feature_num, emb_dim), jnp.float32,
                                    minval=-bound, maxval=bound)

    # ALPT_Embedding.__init__
    grad_scale = 1.0 / (2 ** (bit - 1)) ** 0.5 / (feature_num * emb_dim) ** 0.5
    alpha = jnp.mean(jnp.abs(weight)) * 2.0 / (2 ** (bit - 1)) ** 0.5

    # post_quantizer(): stochastic-floor quantize the stored weight
    low = -(2 ** (bit - 1))
    high = 2 ** (bit - 1) - 1
    alpha_eff = jnp.abs(alpha) + 1e-10
    rnd = jax.random.uniform(k_rand, weight.shape, jnp.float32)
    w_q = jnp.floor(weight / alpha + rnd)
    weight = jnp.clip(w_q, low, high) * alpha_eff

    # TODO(synk): lsq.backward (custom VJP for the alpha parameter) is
    # training-only and is not implemented; only the forward pass is kernelized.
    return weight, alpha, grad_scale


# ---------------------------------- main ----------------------------------- #

if __name__ == "__main__":
    key = jax.random.PRNGKey(0)
    k_param, k_idx = jax.random.split(key)

    feature_num = 64      # vocabulary / feature count
    emb_dim = 128         # embedding dimension
    batch, seq = 2, 8     # x: (B, S) int indices
    bit = 8

    weight, alpha, grad_scale = init_alpt_embedding_params(
        k_param, feature_num, emb_dim, bit, emb_init="normal_0.003")

    x = jax.random.randint(k_idx, (batch, seq), 0, feature_num, dtype=jnp.int32)
    a_eff = float(jnp.abs(alpha) + 1e-10)

    ref = weight[x]                                   # (B, S, D)

    # order == 1 (module default): pure embedding lookup — VMEM-resident path.
    out = alpt_embedding_forward(x, weight, order=1, alpha=a_eff, bit=bit)
    out = jax.block_until_ready(out)
    assert out.shape == (batch, seq, emb_dim)
    assert out.dtype == jnp.float32
    assert jnp.allclose(out, ref, atol=1e-5, rtol=1e-5)

    # order == 2: LSQ fake-quant forward (still VMEM-resident path).
    out2 = alpt_embedding_forward(x, weight, order=2, alpha=a_eff, bit=bit)
    out2 = jax.block_until_ready(out2)
    ref2 = jnp.clip(jnp.round(ref / a_eff),
                    -(2 ** (bit - 1)), 2 ** (bit - 1) - 1) * a_eff
    assert jnp.allclose(out2, ref2, atol=1e-5, rtol=1e-5)

    # Also exercise the large-table HBM gather path (forced) for coverage.
    out3 = alpt_embedding_forward(x, weight, order=1, alpha=a_eff, bit=bit,
                                  force_hbm=True)
    out3 = jax.block_until_ready(out3)
    assert jnp.allclose(out3, ref, atol=1e-5, rtol=1e-5)

    print("KERNEL_OK")
</pallas_src>

<mosaic_0001>
module attributes {stable_mosaic.version = 11 : i64} {
  func.func @_alpt_vmem_table_kernel(%arg0: i32, %arg1: memref<16xi32, #tpu.memory_space<smem>>, %arg2: memref<64x128xf32, #tpu.memory_space<vmem>>, %arg3: memref<16x128xf32, #tpu.memory_space<vmem>>) attributes {dimension_semantics = [#tpu.dimension_semantics<parallel>], iteration_bounds = array<i64: 1>, scalar_prefetch = 1 : i64, scratch_operands = 0 : i64, tpu.core_type = #tpu.core_type<tc>, window_params = [{pipeline_mode = #tpu.pipeline_mode<synchronous>, transform_indices = @transform_0, window_bounds = array<i64: 64, 128>}, {transform_indices = @transform_1, window_bounds = array<i64: 16, 128>}]} {
    %c16_i32 = arith.constant 16 : i32
    %0 = arith.muli %arg0, %c16_i32 : i32
    %c0_i32 = arith.constant 0 : i32
    %c4_i32 = arith.constant 4 : i32
    %1 = arith.addi %c0_i32, %c4_i32 : i32
    %c1_i32 = arith.constant 1 : i32
    scf.for %arg4 = %c0_i32 to %1 step %c1_i32  : i32 {
      %c1_i32_1 = arith.constant 1 : i32
      %2 = arith.muli %arg4, %c1_i32_1 : i32
      %c0_i32_2 = arith.constant 0 : i32
      %3 = arith.addi %c0_i32_2, %2 : i32
      %c4_i32_3 = arith.constant 4 : i32
      %4 = arith.muli %3, %c4_i32_3 : i32
      %c0_i32_4 = arith.constant 0 : i32
      %5 = arith.addi %4, %c0_i32_4 : i32
      %6 = arith.addi %0, %5 : i32
      %7 = arith.index_cast %6 : i32 to index
      %8 = memref.load %arg1[%7] : memref<16xi32, #tpu.memory_space<smem>>
      %9 = arith.index_cast %8 : i32 to index
      %c0 = arith.constant 0 : index
      %10 = vector.load %arg2[%9, %c0] : memref<64x128xf32, #tpu.memory_space<vmem>>, vector<1x128xf32>
      %11 = arith.index_cast %5 : i32 to index
      %c0_5 = arith.constant 0 : index
      %12 = vector.load %arg3[%11, %c0_5] : memref<16x128xf32, #tpu.memory_space<vmem>>, vector<1x128xf32>
      tpu.vector_store %arg3[%11, %c0_5], %10 {strides = array<i32>} : memref<16x128xf32, #tpu.memory_space<vmem>>, vector<1x128xf32>,
      %c1_i32_6 = arith.constant 1 : i32
      %13 = arith.addi %4, %c1_i32_6 : i32
      %14 = arith.addi %0, %13 : i32
      %15 = arith.index_cast %14 : i32 to index
      %16 = memref.load %arg1[%15] : memref<16xi32, #tpu.memory_space<smem>>
      %17 = arith.index_cast %16 : i32 to index
      %c0_7 = arith.constant 0 : index
      %18 = vector.load %arg2[%17, %c0_7] : memref<64x128xf32, #tpu.memory_space<vmem>>, vector<1x128xf32>
      %19 = arith.index_cast %13 : i32 to index
      %c0_8 = arith.constant 0 : index
      %20 = vector.load %arg3[%19, %c0_8] : memref<16x128xf32, #tpu.memory_space<vmem>>, vector<1x128xf32>
      tpu.vector_store %arg3[%19, %c0_8], %18 {strides = array<i32>} : memref<16x128xf32, #tpu.memory_space<vmem>>, vector<1x128xf32>,
      %c2_i32 = arith.constant 2 : i32
      %21 = arith.addi %4, %c2_i32 : i32
      %22 = arith.addi %0, %21 : i32
      %23 = arith.index_cast %22 : i32 to index
      %24 = memref.load %arg1[%23] : memref<16xi32, #tpu.memory_space<smem>>
      %25 = arith.index_cast %24 : i32 to index
      %c0_9 = arith.constant 0 : index
      %26 = vector.load %arg2[%25, %c0_9] : memref<64x128xf32, #tpu.memory_space<vmem>>, vector<1x128xf32>
      %27 = arith.index_cast %21 : i32 to index
      %c0_10 = arith.constant 0 : index
      %28 = vector.load %arg3[%27, %c0_10] : memref<16x128xf32, #tpu.memory_space<vmem>>, vector<1x128xf32>
      tpu.vector_store %arg3[%27, %c0_10], %26 {strides = array<i32>} : memref<16x128xf32, #tpu.memory_space<vmem>>, vector<1x128xf32>,
      %c3_i32 = arith.constant 3 : i32
      %29 = arith.addi %4, %c3_i32 : i32
      %30 = arith.addi %0, %29 : i32
      %31 = arith.index_cast %30 : i32 to index
      %32 = memref.load %arg1[%31] : memref<16xi32, #tpu.memory_space<smem>>
      %33 = arith.index_cast %32 : i32 to index
      %c0_11 = arith.constant 0 : index
      %34 = vector.load %arg2[%33, %c0_11] : memref<64x128xf32, #tpu.memory_space<vmem>>, vector<1x128xf32>
      %35 = arith.index_cast %29 : i32 to index
      %c0_12 = arith.constant 0 : index
      %36 = vector.load %arg3[%35, %c0_12] : memref<16x128xf32, #tpu.memory_space<vmem>>, vector<1x128xf32>
      tpu.vector_store %arg3[%35, %c0_12], %34 {strides = array<i32>} : memref<16x128xf32, #tpu.memory_space<vmem>>, vector<1x128xf32>,
    }
    %c4_i32_0 = arith.constant 4 : i32
    return
  }
  func.func @transform_0(%arg0: i32, %arg1: memref<16xi32, #tpu.memory_space<smem>>) -> (i32, i32) {
    %c0_i32 = arith.constant 0 : i32
    %c0_i32_0 = arith.constant 0 : i32
    %c0_i32_1 = arith.constant 0 : i32
    return %c0_i32, %c0_i32_0 : i32, i32
  }
  func.func @transform_1(%arg0: i32, %arg1: memref<16xi32, #tpu.memory_space<smem>>) -> (i32, i32) {
    %c0_i32 = arith.constant 0 : i32
    %c0_i32_0 = arith.constant 0 : i32
    return %arg0, %c0_i32 : i32, i32
  }
}

</mosaic_0001>

<bundles_post_ra>
// kernel: tpu_custom_call.1
= control target key start
LH: loop header
LB: loop body
LE: loop exit
PB: predicated region body
PF: predicated region fallthrough
CT: control target
= control target key end

     0   :  { %s250_s0 = inlined_call_operand.hbm [shape: s32[16], index: 0, kind: input, shape index: {}]   ;;  %s251_s1 = inlined_call_operand.hbm [shape: f32[64,128], index: 1, kind: input, shape index: {}]   ;;  %s252_s2 = inlined_call_operand.hbm [shape: f32[16,128], index: 2, kind: output, shape index: {}]  }
   0x1   :  { %s120_s11 = scalar_lea.hbm %s250_s0, 16 }
   0x2   :  { %p121_p0 = scmp.ne.s32.totalorder %s250_s0, %s120_s11  ;;  %p124_p1 = scmp.lt.u32.totalorder %s120_s11, %s250_s0 }
   0x4   :  { %p126_p2 = pnand %p124_p1, %p121_p0 }
   0x6   :  { %129 = shalt.err (!%p126_p2)  }
   0x7   :  { %s188_s16 = smov [#allocation3]  }
   0x8   :  { %8 = dma.hbm_to_smem %s250_s0, 16, %s188_s16, [#allocation2] }
   0x9   :  { %178 = dma.done.wait [#allocation2], 16 }
   0xa   :  { %179 = vsyncadd [#allocation2], 4294967280 }
   0xb   :  { %10 = sfence }
   0xc   :  { %11 = vsyncpa [#allocation5], 0 }
   0xd   :  { %12 = vsyncpa [#allocation6], 0  ;;  %s189_s19 = smov [#allocation4]   ;;  %s130_s23 = scalar_lea.hbm %s251_s1, 1024 }
   0xe   :  { %s18_s20 = sshll.u32 %s189_s19, 4  ;;  %p131_p3 = scmp.ne.s32.totalorder %s251_s1, %s130_s23  ;;  %s19_s20 = int_to_ptr.vmem [resolvable:$true] %s18_s20 }
   0xf   :  { %p134_p4 = scmp.lt.u32.totalorder %s130_s23, %s251_s1 }
  0x11   :  { %p136_p5 = pnand %p134_p4, %p131_p3 }
  0x13   :  { %139 = shalt.err (!%p136_p5)
}
  0x14   :  { %s140_s0 = scalar_lea.vmem %s19_s20, 1024  ;;  %p145_p7 = scmp.lt.s32.totalorder %s19_s20, %s19_s20 }
  0x15   :  { %p141_p6 = scmp.ne.s32.totalorder %s19_s20, %s140_s0  ;;  %p146_p8 = scmp.lt.s32.totalorder %s140_s0, %s140_s0 }
  0x17   :  { %p147_p9 = por %p146_p8, %p145_p7 }
  0x19   :  { %p148_p10 = pnand %p147_p9, %p141_p6 }
  0x1b   :  { %151 = shalt.err (!%p148_p10)
}
  0x1c   :  { %s190_s28 = smov 128   ;;  %s191_s29 = smov 8  }
  0x1d   :  { %24 = dma.hbm_to_vmem [thread:$0]  %s251_s1, 1024, %s19_s20, [#allocation5], %s190_s28, %s190_s28, %s191_s29  }
  0x1e   :  { %180 = dma.done.wait [#allocation5], 1024  }
  0x1f   :  { %181 = vsyncadd [#allocation5], 4294966272  ;;  %s184_s4 = smov 0  }
  0x20 LB: > { %s100_s5 = sshll.u32 %s186_s4, 2  ;;  %s34_s4 = sadd.s32 1, %s186_s4   ;;  %s186_s4 = sphi %s184_s4, %s34_s4  }
  0x21   : > { %s37_s6 = sld [smem:[#allocation3 + %s100_s5]]  ;;  %s42_s7 = sadd.s32 1, %s100_s5 }
  0x22   : > { %s49_s8 = sadd.s32 2, %s100_s5  ;;  %s44_s9 = sld [smem:[#allocation3 + %s42_s7]] }
  0x23   : > { %s51_s10 = sld [smem:[#allocation3 + %s49_s8]]  ;;  %s56_s11 = sadd.s32 3, %s100_s5 }
  0x24   : > { %s58_s12 = sld [smem:[#allocation3 + %s56_s11]]  ;;  %s40_s14 = scalar_lea.vmem [#allocation7], %s100_s5 }
  0x25   : > { %p31_p11 = scmp.ge.s32.totalorder %s34_s4, 4  }
  0x26   :  { %s192_s17 = smov (%p31_p11), [#allocation7]  }
  0x27   : > { %s38_s13 = scalar_lea.vmem [#allocation4], %s37_s6  ;;  %33 = sbr.rel (!%p31_p11) target bundleno = 32 (0x20), region = 43 }
  0x28   : > { %v39_v0 = vld [vmem:[%s38_s13] sm:$0x1]  ;;  %s45_s15 = scalar_lea.vmem [#allocation4], %s44_s9  ;;  %s68_s18 = sshll.u32 (%p31_p11), %s192_s17, 4  ;;  %s69_s18 = int_to_ptr.vmem [resolvable:$true] %s68_s18 }
  0x29   : > { %41 = vst [vmem:[%s40_s14] sm:$0x1] %v39_v0  ;;  %v46_v1 = vld [vmem:[%s45_s15] sm:$0x1]  ;;  %s52_s1 = scalar_lea.vmem [#allocation4], %s51_s10  ;;  %s152_s19 = scalar_lea.vmem (%p31_p11), %s69_s18, 256 }
  0x2a   : > { %v53_v2 = vld [vmem:[%s52_s1] sm:$0x1]  ;;  %102 = vst [vmem:[%s40_s14 + $0x1] sm:$0x1] %v46_v1  ;;  %s59_s16 = scalar_lea.vmem [#allocation4], %s58_s12  ;;  %p153_p12 = scmp.ne.s32.totalorder (%p31_p11), %s69_s18, %s152_s19 }
  0x2b   : > { %104 = vst [vmem:[%s40_s14 + $0x2] sm:$0x1] %v53_v2  ;;  %v60_v3 = vld [vmem:[%s59_s16] sm:$0x1]  ;;  %p157_p13 = scmp.lt.s32.totalorder (%p31_p11), %s69_s18, %s69_s18  ;;  %p158_p0 = scmp.lt.s32.totalorder (%p31_p11), %s152_s19, %s152_s19 }
  0x2c   : > { %106 = vst [vmem:[%s40_s14 + $0x3] sm:$0x1] %v60_v3 }
  0x2d   :  { %p159_p1 = por (%p31_p11), %p158_p0, %p157_p13 }
  0x2f   :  { %p160_p2 = pnand %p159_p1, %p153_p12 }
  0x31   :  { %163 = shalt.err (!%p160_p2)
}
  0x32   :  { %s164_s22 = scalar_lea.hbm %s252_s2, 256 }
  0x33   :  { %p165_p3 = scmp.ne.s32.totalorder %s252_s2, %s164_s22  ;;  %p168_p4 = scmp.lt.u32.totalorder %s164_s22, %s252_s2 }
  0x35   :  { %p170_p5 = pnand %p168_p4, %p165_p3 }
  0x37   :  { %173 = shalt.err (!%p170_p5)
}
  0x38   :  { %74 = dma.vmem_to_hbm [thread:$0]  %s69_s18, 256, %s252_s2, [#allocation6], %s190_s28, %s190_s28, %s191_s29  }
  0x39   :  { %182 = dma.done.wait [#allocation6], 256  }
  0x3a   :  { %183 = vsyncadd [#allocation6], 4294967040 }
  0x3b   :  { %78 = vsyncpa [#allocation5], 1 }
  0x3c   :  { %79 = vsyncpa [#allocation6], 1 }

</bundles_post_ra>
